<compile_context>
chip_gen: v5e
topology: v5e:2x2
jax: 0.10.0
libtpu: 0.0.40
codegen_flags: <defaults>
</compile_context>

<pallas_src>
import functools

import jax
import jax.numpy as jnp
from jax import lax
from jax.experimental import pallas as pl
from jax.experimental.pallas import tpu as pltpu


def _round_up(n, m):
    return ((n + m - 1) // m) * m


def _physical_vmem_bytes():
    """Per-TensorCore VMEM capacity; conservative (v7x) fallback if unknown."""
    try:
        info = pltpu.get_tpu_info()
        cap = getattr(info, "vmem_capacity_bytes", None)
        if cap:
            return int(cap)
    except Exception:
        pass
    return 64 * 1024 * 1024


def _self_attentive_sum_kernel(x_ref, wkey_t_ref, wout_ref, values_ref, attn_ref,
                               *, seq_len):
    """One batch tile (TB rows) per grid step.

    x_ref:      [TB, Sp, Dp]  zero-padded input tile
    wkey_t_ref: [Dp, Hp]      key_maker.weight^T  (zero-padded rows/cols)
    wout_ref:   [1, Hp]       key_output.weight   (zero-padded cols)
    values_ref: [TB, Dp]      weighted_values output (padded feature dim)
    attn_ref:   [TB, Sp]      weighted_keys output, sequence on the lane axis
    seq_len:    true (unpadded) sequence length S, static
    """
    tb, sp, dp = x_ref.shape
    x = x_ref[...]                                           # [TB, Sp, Dp]
    wkey_t = wkey_t_ref[...]                                 # [Dp, Hp]
    wout = wout_ref[...]                                     # [1, Hp]

    # mask[b, s] = (input_embed[b, s, 0] != 0)
    mask = jnp.where(x[:, :, 0:1] != 0.0, 1.0, 0.0)          # [TB, Sp, 1]

    # key_maker + ReLU over the whole tile: one fat MXU matmul with M = TB*Sp.
    x2 = x.reshape(tb * sp, dp)
    k_d = jnp.maximum(
        jnp.dot(x2, wkey_t, preferred_element_type=jnp.float32), 0.0)  # [TB*Sp, Hp]

    # key_output (Hp -> 1): VPU multiply + lane reduce (cheaper than N=1 matmul).
    # hidden_dim == 1 path of the module is equivalent to wout == [[1.0]].
    k = jnp.sum(k_d * wout, axis=-1, keepdims=True)          # [TB*Sp, 1]
    k = k.reshape(tb, sp, 1)                                 # [TB, Sp, 1] (Sp % 8 == 0)

    # masked softmax over the sequence dim (exact PyTorch semantics).
    if sp != seq_len:
        # Zero-padded timesteps must not participate in the max (PyTorch's max
        # only sees the real S positions); their exp() argument is clamped to a
        # safe value and their contribution is killed by mask (== 0 there).
        pos = lax.broadcasted_iota(jnp.int32, (tb, sp, 1), 1)
        valid = pos < seq_len
        k_for_max = jnp.where(valid, k, jnp.float32(-1e30))
        k_max = jnp.max(k_for_max, axis=1, keepdims=True)    # [TB, 1, 1]
        e = jnp.exp(jnp.where(valid, k - k_max, 0.0)) * mask
    else:
        k_max = jnp.max(k, axis=1, keepdims=True)            # [TB, 1, 1]
        e = jnp.exp(k - k_max) * mask                        # [TB, Sp, 1]
    attn = e / (jnp.sum(e, axis=1, keepdims=True) + 1e-20)   # [TB, Sp, 1]

    # weighted_values[b, :] = sum_s attn[b, s] * x[b, s, :]  (sublane-dense store)
    values_ref[...] = jnp.sum(attn * x, axis=1)              # [TB, Dp]
    # lane-dense attention output; trailing [..., 1] added by the wrapper.
    attn_ref[...] = attn[:, :, 0]                            # [TB, Sp]


@jax.jit
def self_attentive_sum(input_embed, w_key, w_out):
    """Fused Pallas forward of SelfAttentiveSum.

    input_embed: [B, S, D] float32
    w_key:       [H, D]    key_maker.weight   (nn.Linear(D, H, bias=False))
    w_out:       [1, H]    key_output.weight  (nn.Linear(H, 1, bias=False))
    returns (weighted_values [B, D], weighted_keys [B, S, 1])
    """
    B, S, D = input_embed.shape
    H = w_key.shape[0]
    f32 = jnp.float32

    # Lane/sublane-friendly padded sizes. Zero padding is numerically
    # transparent: padded W rows/cols are zero, padded timesteps have mask 0,
    # padded batch rows / feature columns are sliced off below.
    Dp = _round_up(D, 128)
    Hp = _round_up(H, 128)
    Sp = _round_up(S, 8)

    phys_vmem = _physical_vmem_bytes()

    # --- batch-tile selection --------------------------------------------------
    # Double-buffered input tile 2 * TB*Sp*Dp*4 B must sit comfortably in VMEM
    # on every generation (64 MiB/TC on v7x, 128 MiB on v5e/v6e).  TB is a
    # multiple of 8 so the 2-D output blocks are sublane-dense.
    row_bytes = Sp * Dp * 4
    per_buffer_budget = max(min(phys_vmem // 8, 16 * 1024 * 1024), 512 * 1024)
    max_tb = max(8, (per_buffer_budget // row_bytes) // 8 * 8)
    max_tb = min(max_tb, 512)
    TB = min(_round_up(B, 8), max_tb)
    Bp = _round_up(B, TB)

    x_p = jnp.pad(input_embed.astype(f32),
                  ((0, Bp - B), (0, Sp - S), (0, Dp - D)))
    wkey_t = jnp.pad(w_key.astype(f32).T, ((0, Dp - D), (0, Hp - H)))   # [Dp, Hp]
    wout_p = jnp.pad(w_out.astype(f32), ((0, 0), (0, Hp - H)))          # [1, Hp]

    # Raise the scoped VMEM limit only as far as needed, never above physical/2
    # (keeps v7x's 64 MiB safe while letting v5e/v6e grow the tile).
    needed = (2 * TB * Sp * Dp * 4            # double-buffered input tile
              + 2 * TB * (Dp + Sp) * 4        # double-buffered outputs
              + Dp * Hp * 4 + Hp * 4)         # resident weights
    vmem_limit = int(min(phys_vmem // 2,
                         max(32 * 1024 * 1024, needed * 5 // 4)))

    kernel = functools.partial(_self_attentive_sum_kernel, seq_len=S)

    values_p, attn_p = pl.pallas_call(
        kernel,
        out_shape=(
            jax.ShapeDtypeStruct((Bp, Dp), f32),   # weighted_values (padded)
            jax.ShapeDtypeStruct((Bp, Sp), f32),   # weighted_keys, lane-dense
        ),
        grid=(Bp // TB,),
        in_specs=[
            pl.BlockSpec((TB, Sp, Dp), lambda b: (b, 0, 0)),   # batch tile / step
            pl.BlockSpec((Dp, Hp), lambda b: (0, 0)),          # resident weight
            pl.BlockSpec((1, Hp), lambda b: (0, 0)),           # resident weight
        ],
        out_specs=(
            pl.BlockSpec((TB, Dp), lambda b: (b, 0)),
            pl.BlockSpec((TB, Sp), lambda b: (b, 0)),
        ),
        compiler_params=pltpu.CompilerParams(
            dimension_semantics=("parallel",),     # batch tiles independent
            vmem_limit_bytes=vmem_limit,
        ),
    )(x_p, wkey_t, wout_p)

    weighted_values = values_p[:B, :D]                       # drop padding
    weighted_keys = attn_p[:B, :S][:, :, None]               # [B, S, 1]
    return weighted_values, weighted_keys


def _reference_forward(input_embed, w_key, w_out):
    """Pure-JAX reference matching the PyTorch module."""
    B, S, D = input_embed.shape
    mask = (input_embed[:, :, 0] != 0).astype(jnp.float32)              # [B, S]
    x2 = input_embed.reshape(-1, D)
    k_d = jax.nn.relu(x2 @ w_key.T)                                     # [B*S, H]
    k = (k_d @ w_out.T).reshape(B, S)                                   # [B, S]
    k_max = jnp.max(k, axis=1, keepdims=True)
    e = jnp.exp(k - k_max) * mask
    attn = e / (jnp.sum(e, axis=1, keepdims=True) + 1e-20)              # [B, S]
    values = jnp.sum(attn[:, :, None] * input_embed, axis=1)            # [B, D]
    return values, attn[:, :, None]


if __name__ == "__main__":
    key = jax.random.PRNGKey(0)
    k_x, k_key, k_out = jax.random.split(key, 3)

    B, S, D, H = 2, 8, 100, 32          # batch, seq, output_dim, hidden_dim
    x = jax.random.normal(k_x, (B, S, D), jnp.float32)
    # zero trailing timesteps (padding) so the feature-0 mask is non-trivial
    lengths = jnp.array([6, 4])
    valid = (jnp.arange(S)[None, :] < lengths[:, None]).astype(jnp.float32)
    x = x * valid[:, :, None]

    w_key = jax.random.normal(k_key, (H, D), jnp.float32) * 0.1   # key_maker.weight
    w_out = jax.random.normal(k_out, (1, H), jnp.float32) * 0.1   # key_output.weight

    values, attn = self_attentive_sum(x, w_key, w_out)
    jax.block_until_ready((values, attn))

    ref_values, ref_attn = _reference_forward(x, w_key, w_out)
    assert values.shape == (B, D) and attn.shape == (B, S, 1)
    assert jnp.allclose(values, ref_values, rtol=1e-3, atol=1e-4), "weighted_values mismatch"
    assert jnp.allclose(attn, ref_attn, rtol=1e-3, atol=1e-4), "weighted_keys mismatch"

    print("KERNEL_OK")
</pallas_src>

<mosaic_0001>
module attributes {stable_mosaic.version = 11 : i64} {
  func.func @_self_attentive_sum_kernel(%arg0: i32, %arg1: memref<8x8x128xf32, #tpu.memory_space<vmem>>, %arg2: memref<128x128xf32, #tpu.memory_space<vmem>>, %arg3: memref<1x128xf32, #tpu.memory_space<vmem>>, %arg4: memref<8x128xf32, #tpu.memory_space<vmem>>, %arg5: memref<8x8xf32, #tpu.memory_space<vmem>>) attributes {dimension_semantics = [#tpu.dimension_semantics<parallel>], iteration_bounds = array<i64: 1>, scalar_prefetch = 0 : i64, scratch_operands = 0 : i64, tpu.core_type = #tpu.core_type<tc>, window_params = [{transform_indices = @transform_0, window_bounds = array<i64: 8, 8, 128>}, {pipeline_mode = #tpu.pipeline_mode<synchronous>, transform_indices = @transform_1, window_bounds = array<i64: 128, 128>}, {pipeline_mode = #tpu.pipeline_mode<synchronous>, transform_indices = @transform_2, window_bounds = array<i64: 1, 128>}, {transform_indices = @transform_3, window_bounds = array<i64: 8, 128>}, {transform_indices = @transform_4, window_bounds = array<i64: 8, 8>}]} {
    %c0 = arith.constant 0 : index
    %c0_0 = arith.constant 0 : index
    %c0_1 = arith.constant 0 : index
    %0 = vector.load %arg1[%c0, %c0_0, %c0_1] : memref<8x8x128xf32, #tpu.memory_space<vmem>>, vector<8x8x128xf32>
    %c0_2 = arith.constant 0 : index
    %c0_3 = arith.constant 0 : index
    %1 = vector.load %arg2[%c0_2, %c0_3] : memref<128x128xf32, #tpu.memory_space<vmem>>, vector<128x128xf32>
    %c0_4 = arith.constant 0 : index
    %c0_5 = arith.constant 0 : index
    %2 = vector.load %arg3[%c0_4, %c0_5] : memref<1x128xf32, #tpu.memory_space<vmem>>, vector<1x128xf32>
    %3 = vector.extract_strided_slice %0 {offsets = [0, 0, 0], sizes = [8, 8, 1], strides = [1, 1, 1]} : vector<8x8x128xf32> to vector<8x8x1xf32>
    %cst = arith.constant 0.000000e+00 : f32
    %4 = vector.broadcast %cst : f32 to vector<8x8x1xf32>
    %5 = arith.cmpf one, %3, %4 : vector<8x8x1xf32>
    %cst_6 = arith.constant 1.000000e+00 : f32
    %cst_7 = arith.constant 0.000000e+00 : f32
    %6 = vector.broadcast %cst_6 : f32 to vector<8x8x1xf32>
    %7 = vector.broadcast %cst_7 : f32 to vector<8x8x1xf32>
    %8 = arith.select %5, %6, %7 : vector<8x8x1xi1>, vector<8x8x1xf32>
    %9 = vector.shape_cast %0 : vector<8x8x128xf32> to vector<64x128xf32>
    %cst_8 = arith.constant dense<0.000000e+00> : vector<64x128xf32>
    %10 = tpu.matmul %9, %1, %cst_8 {dimension_numbers = #tpu.dot_dimension_numbers<[1], [0], [0], [1], [0, 0, 1, 1], [], []>} : vector<64x128xf32>, vector<128x128xf32>, vector<64x128xf32> -> vector<64x128xf32>
    %cst_9 = arith.constant 0.000000e+00 : f32
    %11 = vector.broadcast %cst_9 : f32 to vector<64x128xf32>
    %12 = arith.maximumf %10, %11 : vector<64x128xf32>
    %13 = vector.broadcast %2 : vector<1x128xf32> to vector<64x128xf32>
    %14 = arith.mulf %12, %13 : vector<64x128xf32>
    %cst_10 = arith.constant dense<0.000000e+00> : vector<64xf32>
    %15 = vector.multi_reduction <add>, %14, %cst_10 [1] : vector<64x128xf32> to vector<64xf32>
    %16 = vector.shape_cast %15 : vector<64xf32> to vector<64x1xf32>
    %17 = vector.shape_cast %16 : vector<64x1xf32> to vector<8x8x1xf32>
    %cst_11 = arith.constant dense<0xFF800000> : vector<8x1xf32>
    %18 = vector.multi_reduction <maximumf>, %17, %cst_11 [1] : vector<8x8x1xf32> to vector<8x1xf32>
    %19 = vector.shape_cast %18 : vector<8x1xf32> to vector<8x1x1xf32>
    %20 = vector.broadcast %19 : vector<8x1x1xf32> to vector<8x8x1xf32>
    %21 = arith.subf %17, %20 : vector<8x8x1xf32>
    %22 = math.exp %21 : vector<8x8x1xf32>
    %23 = arith.mulf %22, %8 : vector<8x8x1xf32>
    %cst_12 = arith.constant dense<0.000000e+00> : vector<8x1xf32>
    %24 = vector.multi_reduction <add>, %23, %cst_12 [1] : vector<8x8x1xf32> to vector<8x1xf32>
    %25 = vector.shape_cast %24 : vector<8x1xf32> to vector<8x1x1xf32>
    %cst_13 = arith.constant 9.99999968E-21 : f32
    %26 = vector.broadcast %cst_13 : f32 to vector<8x1x1xf32>
    %27 = arith.addf %25, %26 : vector<8x1x1xf32>
    %28 = vector.broadcast %27 : vector<8x1x1xf32> to vector<8x8x1xf32>
    %29 = arith.divf %23, %28 : vector<8x8x1xf32>
    %30 = vector.broadcast %29 : vector<8x8x1xf32> to vector<8x8x128xf32>
    %31 = arith.mulf %30, %0 : vector<8x8x128xf32>
    %cst_14 = arith.constant dense<0.000000e+00> : vector<8x128xf32>
    %32 = vector.multi_reduction <add>, %31, %cst_14 [1] : vector<8x8x128xf32> to vector<8x128xf32>
    %c0_15 = arith.constant 0 : index
    %c0_16 = arith.constant 0 : index
    %33 = vector.load %arg4[%c0_15, %c0_16] : memref<8x128xf32, #tpu.memory_space<vmem>>, vector<8x128xf32>
    tpu.vector_store %arg4[%c0_15, %c0_16], %32 {strides = array<i32>} : memref<8x128xf32, #tpu.memory_space<vmem>>, vector<8x128xf32>,
    %34 = vector.shape_cast %29 : vector<8x8x1xf32> to vector<8x8xf32>
    %c0_17 = arith.constant 0 : index
    %c0_18 = arith.constant 0 : index
    %35 = vector.load %arg5[%c0_17, %c0_18] : memref<8x8xf32, #tpu.memory_space<vmem>>, vector<8x8xf32>
    tpu.vector_store %arg5[%c0_17, %c0_18], %34 {strides = array<i32>} : memref<8x8xf32, #tpu.memory_space<vmem>>, vector<8x8xf32>,
    return
  }
  func.func @transform_0(%arg0: i32) -> (i32, i32, i32) {
    %c0_i32 = arith.constant 0 : i32
    %c0_i32_0 = arith.constant 0 : i32
    %c0_i32_1 = arith.constant 0 : i32
    return %arg0, %c0_i32, %c0_i32_0 : i32, i32, i32
  }
  func.func @transform_1(%arg0: i32) -> (i32, i32) {
    %c0_i32 = arith.constant 0 : i32
    %c0_i32_0 = arith.constant 0 : i32
    %c0_i32_1 = arith.constant 0 : i32
    return %c0_i32, %c0_i32_0 : i32, i32
  }
  func.func @transform_2(%arg0: i32) -> (i32, i32) {
    %c0_i32 = arith.constant 0 : i32
    %c0_i32_0 = arith.constant 0 : i32
    %c0_i32_1 = arith.constant 0 : i32
    return %c0_i32, %c0_i32_0 : i32, i32
  }
  func.func @transform_3(%arg0: i32) -> (i32, i32) {
    %c0_i32 = arith.constant 0 : i32
    %c0_i32_0 = arith.constant 0 : i32
    return %arg0, %c0_i32 : i32, i32
  }
  func.func @transform_4(%arg0: i32) -> (i32, i32) {
    %c0_i32 = arith.constant 0 : i32
    %c0_i32_0 = arith.constant 0 : i32
    return %arg0, %c0_i32 : i32, i32
  }
}

</mosaic_0001>

<bundles_post_ra>
// kernel: self_attentive_sum.1
= control target key start
LH: loop header
LB: loop body
LE: loop exit
PB: predicated region body
PF: predicated region fallthrough
CT: control target
= control target key end

     0   :  { %v632_v55 = vmov 0   ;;  %vm213_vm3 = vcmask 7168   ;;  %s912_s1 = inlined_call_operand.vmem [shape: f32[128,128], index: 1, kind: input, shape index: {}]   ;;  %s913_s0 = inlined_call_operand.vmem [shape: f32[8,8,128], index: 0, kind: input, shape index: {}]   ;;  %s914_s2 = inlined_call_operand.vmem [shape: f32[1,128], index: 2, kind: input, shape index: {}]   ;;  %s915_s4 = inlined_call_operand.vmem [shape: f32[8,8], index: 4, kind: output, shape index: {1}]   ;;  %s916_s3 = inlined_call_operand.vmem [shape: f32[8,128], index: 3, kind: output, shape index: {0}]  }
   0x1   :  { %v39_v0 = vld [vmem:[%s912_s1 + $0x78] sm:$0xff]  ;;  %v38_v1 = vld [vmem:[%s912_s1 + $0x70] sm:$0xff]  ;;  %v37_v2 = vld [vmem:[%s912_s1 + $0x68] sm:$0xff]  ;;  %598 = vset.pattern.permute.xlu1 %v632_v55  ;;  %596 = vset.pattern.permute.xlu2 %v632_v55 }
   0x2   :  { %57 = vmatpush.msra.mxu0 %v39_v0  ;;  %546 = vmatpush.msra.mxu1 %v39_v0  ;;  %v36_v3 = vld [vmem:[%s912_s1 + $0x60] sm:$0xff]  ;;  %v35_v4 = vld [vmem:[%s912_s1 + $0x58] sm:$0xff]  ;;  %v34_v5 = vld [vmem:[%s912_s1 + $0x50] sm:$0xff] }
   0x3   :  { %547 = vmatpush.msra.mxu2 %v39_v0  ;;  %548 = vmatpush.msra.mxu3 %v39_v0  ;;  %v33_v6 = vld [vmem:[%s912_s1 + $0x48] sm:$0xff]  ;;  %v32_v7 = vld [vmem:[%s912_s1 + $0x40] sm:$0xff]  ;;  %v31_v8 = vld [vmem:[%s912_s1 + $0x38] sm:$0xff] }
   0x4   :  { %58 = vmatpush.msra.mxu0 %v38_v1  ;;  %549 = vmatpush.msra.mxu1 %v38_v1  ;;  %v30_v9 = vld [vmem:[%s912_s1 + $0x30] sm:$0xff]  ;;  %v29_v10 = vld [vmem:[%s912_s1 + $0x28] sm:$0xff]  ;;  %v28_v11 = vld [vmem:[%s912_s1 + $0x20] sm:$0xff] }
   0x5   :  { %550 = vmatpush.msra.mxu2 %v38_v1  ;;  %551 = vmatpush.msra.mxu3 %v38_v1  ;;  %v27_v12 = vld [vmem:[%s912_s1 + $0x18] sm:$0xff]  ;;  %v26_v13 = vld [vmem:[%s912_s1 + $0x10] sm:$0xff]  ;;  %v25_v14 = vld [vmem:[%s912_s1 + $0x8] sm:$0xff] }
   0x6   :  { %59 = vmatpush.msra.mxu0 %v37_v2  ;;  %552 = vmatpush.msra.mxu1 %v37_v2  ;;  %v24_v15 = vld [vmem:[%s912_s1] sm:$0xff]  ;;  %v715_v17 = vld [vmem:[%s913_s0 + $0x10] sm:$0xff]  ;;  %v734_v20 = vld [vmem:[%s913_s0 + $0x8] sm:$0xff] }
   0x7   :  { %553 = vmatpush.msra.mxu2 %v37_v2  ;;  %554 = vmatpush.msra.mxu3 %v37_v2  ;;  %v710_v16 = vld [vmem:[%s913_s0] sm:$0xff]  ;;  %v726_v19 = vld [vmem:[%s913_s0 + $0x30] sm:$0xff]  ;;  %v739_v21 = vld [vmem:[%s913_s0 + $0x18] sm:$0xff]  ;;  %vm43_vm1 = vcmp.ne.f32.partialorder %v715_v17, 0.0  ;;  %vm42_vm4 = vcmp.ne.f32.partialorder %v734_v20, 0.0 }
   0x8   :  { %60 = vmatpush.msra.mxu0 %v36_v3  ;;  %555 = vmatpush.msra.mxu1 %v36_v3  ;;  %v720_v18 = vld [vmem:[%s913_s0 + $0x20] sm:$0xff]  ;;  %v744_v22 = vld [vmem:[%s913_s0 + $0x28] sm:$0xff]  ;;  %v750_v23 = vld [vmem:[%s913_s0 + $0x38] sm:$0xff]  ;;  %vm41_vm0 = vcmp.ne.f32.partialorder %v710_v16, 0.0  ;;  %vm44_vm5 = vcmp.ne.f32.partialorder %v739_v21, 0.0  ;;  %vm47_vm8 = vcmp.ne.f32.partialorder %v726_v19, 0.0 }
   0x9   :  { %556 = vmatpush.msra.mxu2 %v36_v3  ;;  %557 = vmatpush.msra.mxu3 %v36_v3  ;;  %v599_v24 = vld [vmem:[%s914_s2] ss:$0 sm:$0xff]  ;;  %vm45_vm2 = vcmp.ne.f32.partialorder %v720_v18, 0.0  ;;  %vm46_vm6 = vcmp.ne.f32.partialorder %v744_v22, 0.0  ;;  %vm48_vm7 = vcmp.ne.f32.partialorder %v750_v23, 0.0 }
   0xa   :  { %61 = vmatpush.msra.mxu0 %v35_v4  ;;  %558 = vmatpush.msra.mxu1 %v35_v4 }
   0xb   :  { %559 = vmatpush.msra.mxu2 %v35_v4  ;;  %560 = vmatpush.msra.mxu3 %v35_v4 }
   0xc   :  { %62 = vmatpush.msra.mxu0 %v34_v5  ;;  %561 = vmatpush.msra.mxu1 %v34_v5 }
   0xd   :  { %562 = vmatpush.msra.mxu2 %v34_v5  ;;  %563 = vmatpush.msra.mxu3 %v34_v5 }
   0xe   :  { %63 = vmatpush.msra.mxu0 %v33_v6  ;;  %564 = vmatpush.msra.mxu1 %v33_v6 }
   0xf   :  { %565 = vmatpush.msra.mxu2 %v33_v6  ;;  %566 = vmatpush.msra.mxu3 %v33_v6 }
  0x10   :  { %64 = vmatpush.msra.mxu0 %v32_v7  ;;  %567 = vmatpush.msra.mxu1 %v32_v7 }
  0x11   :  { %568 = vmatpush.msra.mxu2 %v32_v7  ;;  %569 = vmatpush.msra.mxu3 %v32_v7 }
  0x12   :  { %65 = vmatpush.msra.mxu0 %v31_v8  ;;  %570 = vmatpush.msra.mxu1 %v31_v8 }
  0x13   :  { %571 = vmatpush.msra.mxu2 %v31_v8  ;;  %572 = vmatpush.msra.mxu3 %v31_v8 }
  0x14   :  { %66 = vmatpush.msra.mxu0 %v30_v9  ;;  %573 = vmatpush.msra.mxu1 %v30_v9 }
  0x15   :  { %574 = vmatpush.msra.mxu2 %v30_v9  ;;  %575 = vmatpush.msra.mxu3 %v30_v9 }
  0x16   :  { %67 = vmatpush.msra.mxu0 %v29_v10  ;;  %576 = vmatpush.msra.mxu1 %v29_v10 }
  0x17   :  { %577 = vmatpush.msra.mxu2 %v29_v10  ;;  %578 = vmatpush.msra.mxu3 %v29_v10 }
  0x18   :  { %68 = vmatpush.msra.mxu0 %v28_v11  ;;  %579 = vmatpush.msra.mxu1 %v28_v11 }
  0x19   :  { %580 = vmatpush.msra.mxu2 %v28_v11  ;;  %581 = vmatpush.msra.mxu3 %v28_v11 }
  0x1a   :  { %69 = vmatpush.msra.mxu0 %v27_v12  ;;  %582 = vmatpush.msra.mxu1 %v27_v12 }
  0x1b   :  { %583 = vmatpush.msra.mxu2 %v27_v12  ;;  %584 = vmatpush.msra.mxu3 %v27_v12 }
  0x1c   :  { %70 = vmatpush.msra.mxu0 %v26_v13  ;;  %585 = vmatpush.msra.mxu1 %v26_v13 }
  0x1d   :  { %586 = vmatpush.msra.mxu2 %v26_v13  ;;  %587 = vmatpush.msra.mxu3 %v26_v13 }
  0x1e   :  { %71 = vmatpush.msra.mxu0 %v25_v14  ;;  %588 = vmatpush.msra.mxu1 %v25_v14 }
  0x1f   :  { %589 = vmatpush.msra.mxu2 %v25_v14  ;;  %590 = vmatpush.msra.mxu3 %v25_v14 }
  0x20   :  { %72 = vmatpush.msra.mxu0 %v24_v15  ;;  %591 = vmatpush.msra.mxu1 %v24_v15 }
  0x21   :  { %592 = vmatpush.msra.mxu2 %v24_v15  ;;  %73 = vmatmul.f32.vlgmr.msra.gmra.mxu0 %v710_v16 }
  0x22   :  { %79 = vmatmul.f32.vlgmr.msra.gmra.mxu1 %v715_v17  ;;  %85 = vmatmul.f32.vlgmr.msra.gmra.mxu2 %v720_v18 }
  0x23   :  { %593 = vmatpush.msra.mxu3 %v24_v15  ;;  %597 = vset.pattern.permute.xlu0 %v632_v55 }
  0x24   :  { %91 = vmatmul.f32.vlgmr.msra.gmra.mxu3 %v726_v19 }
  0x29   :  { %76 = vmatmul.f32.gmra.mxu0 %v734_v20 }
  0x2a   :  { %82 = vmatmul.f32.gmra.mxu1 %v739_v21  ;;  %88 = vmatmul.f32.gmra.mxu2 %v744_v22 }
  0x2c   :  { %94 = vmatmul.f32.gmra.mxu3 %v750_v23 }
  0x9e   :  { %v74_v25 = vpop.f32.mrf.mxu0 }
  0x9f   :  { %v98_v26 = vmax.f32 %v74_v25, 0.0  ;;  %v80_v27 = vpop.f32.mrf.mxu1 }
  0xa0   :  { %v100_v28 = vmax.f32 %v80_v27, 0.0 }
  0xa1   :  { %v109_v29 = vmul.f32 %v599_v24, %v98_v26 }
  0xa2   :  { %v111_v30 = vmul.f32 %v599_v24, %v100_v28 }
  0xa3   :  { %117 = vadd.xlane.f32.xlu0 %v109_v29 }
  0xa4   :  { %121 = vadd.xlane.f32.xlu1 %v111_v30 }
  0xa5   :  { %v86_v31 = vpop.f32.mrf.mxu2 }
  0xa6   :  { %v102_v32 = vmax.f32 %v86_v31, 0.0  ;;  %v77_v33 = vpop.f32.mrf.mxu0 }
  0xa7   :  { %v99_v34 = vmax.f32 %v77_v33, 0.0  ;;  %v83_v35 = vpop.f32.mrf.mxu1  ;;  %v92_v36 = vpop.f32.mrf.mxu3 }
  0xa8   :  { %v101_v37 = vmax.f32 %v83_v35, 0.0  ;;  %v113_v38 = vmul.f32 %v599_v24, %v102_v32  ;;  %v104_v41 = vmax.f32 %v92_v36, 0.0 }
  0xa9   :  { %v110_v39 = vmul.f32 %v599_v24, %v99_v34 }
  0xaa   :  { %125 = vadd.xlane.f32.xlu2 %v113_v38  ;;  %v112_v40 = vmul.f32 %v599_v24, %v101_v37  ;;  %v115_v47 = vmul.f32 %v599_v24, %v104_v41 }
  0xab   :  { %119 = vadd.xlane.f32.xlu0 %v110_v39 }
  0xac   :  { %123 = vadd.xlane.f32.xlu1 %v112_v40  ;;  %v633_v40 = vmov 0.0  }
  0xad   :  { %v89_v42 = vpop.f32.mrf.mxu2  ;;  %v49_v41 = vsel %vm41_vm0, 1.0, %v633_v40 }
  0xae   :  { %v103_v43 = vmax.f32 %v89_v42, 0.0 }
  0xaf   :  { %v95_v44 = vpop.f32.mrf.mxu3 }
  0xb0   :  { %v105_v45 = vmax.f32 %v95_v44, 0.0  ;;  %v114_v46 = vmul.f32 %v599_v24, %v103_v43 }
  0xb2   :  { %127 = vadd.xlane.f32.xlu2 %v114_v46  ;;  %v116_v48 = vmul.f32 %v599_v24, %v105_v45  ;;  %v51_v45 = vsel %vm43_vm1, 1.0, %v633_v40 }
  0xb3   :  { %129 = vadd.xlane.f32.xlu0 %v115_v47 }
  0xb4   :  { %131 = vadd.xlane.f32.xlu1 %v116_v48 }
 0x116   :  { %v118_v49 = vpop.xlane.xlu0 %117 }
 0x117   :  { %v122_v50 = vpop.xlane.xlu1 %121  ;;  %v133_v51 = vrot.slane %v118_v49, 4 }
 0x118   :  { %v145_v52 = vrot.slane %v122_v50, 4 }
 0x119   :  { %v134_v53 = vmax.f32 %v118_v49, %v133_v51 }
 0x11a   :  { %v146_v54 = vmax.f32 %v122_v50, %v145_v52 }
 0x11b   :  { %v135_v56 = vrot.slane %v134_v53, 2 }
 0x11c   :  { %v147_v57 = vrot.slane %v146_v54, 2 }
 0x11d   :  { %v136_v58 = vmax.f32 %v134_v53, %v135_v56  ;;  %v126_v59 = vpop.xlane.xlu2 %125 }
 0x11e   :  { %v148_v60 = vmax.f32 %v146_v54, %v147_v57  ;;  %v157_v61 = vrot.slane %v126_v59, 4  ;;  %v120_v62 = vpop.xlane.xlu0 %119 }
 0x11f   :  { %v137_v63 = vrot.slane %v136_v58, 1  ;;  %v124_v0 = vpop.xlane.xlu1 %123  ;;  %v139_v1 = vrot.slane %v120_v62, 4 }
 0x120   :  { %v149_v2 = vrot.slane %v148_v60, 1  ;;  %v158_v3 = vmax.f32 %v126_v59, %v157_v61  ;;  %v151_v4 = vrot.slane %v124_v0, 4 }
 0x121   :  { %v138_v5 = vmax.f32 %v136_v58, %v137_v63  ;;  %v140_v6 = vmax.f32 %v120_v62, %v139_v1 }
 0x122   :  { %v150_v7 = vmax.f32 %v148_v60, %v149_v2  ;;  %v159_v8 = vrot.slane %v158_v3, 2  ;;  %v152_v9 = vmax.f32 %v124_v0, %v151_v4 }
 0x123   :  { %v181_v10 = vsub.f32 %v118_v49, %v138_v5  ;;  %v141_v11 = vrot.slane %v140_v6, 2  ;;  %v53_v5 = vsel %vm45_vm2, 1.0, %v633_v40 }
 0x124   :  { %v183_v12 = vsub.f32 %v122_v50, %v150_v7  ;;  %v160_v13 = vmax.f32 %v158_v3, %v159_v8  ;;  %v153_v14 = vrot.slane %v152_v9, 2  ;;  %v50_v8 = vsel %vm42_vm4, 1.0, %v633_v40 }
 0x125   :  { %v189_v15 = vmul.f32 1.442695, %v181_v10  ;;  %v142_v24 = vmax.f32 %v140_v6, %v141_v11  ;;  %v128_v25 = vpop.xlane.xlu2 %127 }
 0x126   :  { %v193_v26 = vmul.f32 1.442695, %v183_v12  ;;  %v161_v27 = vrot.slane %v160_v13, 1  ;;  %v154_v28 = vmax.f32 %v152_v9, %v153_v14  ;;  %v163_v29 = vrot.slane %v128_v25, 4  ;;  %v759_v30 = vpop.xlane.xlu0 %129 }
 0x127   :  { %600 = vpow2.f32 %v189_v15  ;;  %v143_v31 = vrot.slane %v142_v24, 1  ;;  %v762_v32 = vpop.xlane.xlu1 %131  ;;  %v169_v33 = vrot.slane %v759_v30, 4 }
 0x128   :  { %602 = vpow2.f32 %v193_v26  ;;  %v162_v34 = vmax.f32 %v160_v13, %v161_v27  ;;  %v155_v35 = vrot.slane %v154_v28, 1  ;;  %v164_v36 = vmax.f32 %v128_v25, %v163_v29 }
 0x129   :  { %v144_v37 = vmax.f32 %v142_v24, %v143_v31  ;;  %v175_v38 = vrot.slane %v762_v32, 4  ;;  %v170_v39 = vmax.f32 %v759_v30, %v169_v33  ;;  %v52_v24 = vsel %vm44_vm5, 1.0, %v633_v40 }
 0x12a   :  { %v185_v42 = vsub.f32 %v126_v59, %v162_v34  ;;  %v156_v43 = vmax.f32 %v154_v28, %v155_v35  ;;  %v165_v44 = vrot.slane %v164_v36, 2 }
 0x12b   :  { %v182_v46 = vsub.f32 %v120_v62, %v144_v37  ;;  %v176_v47 = vmax.f32 %v762_v32, %v175_v38  ;;  %v171_v48 = vrot.slane %v170_v39, 2 }
 0x12c   :  { %v197_v49 = vmul.f32 1.442695, %v185_v42  ;;  %v184_v50 = vsub.f32 %v124_v0, %v156_v43  ;;  %v166_v51 = vmax.f32 %v164_v36, %v165_v44 }
 0x12d   :  { %v601_v52 = vpop.eup %600  ;;  %v191_v53 = vmul.f32 1.442695, %v182_v46  ;;  %v177_v54 = vrot.slane %v176_v47, 2  ;;  %v172_v55 = vmax.f32 %v170_v39, %v171_v48 }
 0x12e   :  { %v603_v56 = vpop.eup %602  ;;  %604 = vpow2.f32 %v197_v49  ;;  %v195_v57 = vmul.f32 1.442695, %v184_v50  ;;  %v167_v58 = vrot.slane %v166_v51, 1  ;;  %v775_v59 = vmul.f32 %v601_v52, %v49_v41 }
 0x12f   :  { %606 = vpow2.f32 %v191_v53  ;;  %v178_v60 = vmax.f32 %v176_v47, %v177_v54  ;;  %v173_v61 = vrot.slane %v172_v55, 1  ;;  %v777_v62 = vmul.f32 %v603_v56, %v51_v45 }
 0x130   :  { %608 = vpow2.f32 %v195_v57  ;;  %v168_v63 = vmax.f32 %v166_v51, %v167_v58  ;;  %v214_v0 = vsel %vm213_vm3, %v775_v59, 0.0  ;;  %v54_v45 = vsel %vm46_vm6, 1.0, %v633_v40 }
 0x131   :  { %v179_v1 = vrot.slane %v178_v60, 1  ;;  %v174_v2 = vmax.f32 %v172_v55, %v173_v61  ;;  %v228_v3 = vsel %vm213_vm3, %v777_v62, 0.0  ;;  %v215_v4 = vrot.slane %v214_v0, 4 }
 0x132   :  { %v186_v6 = vsub.f32 %v128_v25, %v168_v63  ;;  %v229_v7 = vrot.slane %v228_v3, 4 }
 0x133   :  { %v180_v9 = vmax.f32 %v178_v60, %v179_v1  ;;  %v187_v10 = vsub.f32 %v759_v30, %v174_v2  ;;  %v216_v11 = vadd.f32 %v215_v4, %v214_v0  ;;  %v56_v60 = vsel %vm48_vm7, 1.0, %v633_v40 }
 0x134   :  { %v605_v12 = vpop.eup %604  ;;  %v199_v13 = vmul.f32 1.442695, %v186_v6  ;;  %v230_v14 = vadd.f32 %v229_v7, %v228_v3  ;;  %v55_v1 = vsel %vm47_vm8, 1.0, %v633_v40 }
 0x135   :  { %v607_v15 = vpop.eup %606  ;;  %v188_v26 = vsub.f32 %v762_v32, %v180_v9  ;;  %v217_v27 = vrot.slane %v216_v11, 2  ;;  %v792_v28 = vmul.f32 %v605_v12, %v53_v5  ;;  %v201_v33 = vmul.f32 1.442695, %v187_v10 }
 0x136   :  { %v609_v29 = vpop.eup %608  ;;  %610 = vpow2.f32 %v199_v13  ;;  %v231_v25 = vrot.slane %v230_v14, 2  ;;  %v795_v31 = vmul.f32 %v607_v15, %v50_v8 }
 0x137   :  { %v203_v30 = vmul.f32 1.442695, %v188_v26  ;;  %v218_v34 = vadd.f32 %v217_v27, %v216_v11  ;;  %v242_v35 = vsel %vm213_vm3, %v792_v28, 0.0  ;;  %v801_v38 = vmul.f32 %v609_v29, %v52_v24 }
 0x138   :  { %v232_v36 = vadd.f32 %v231_v25, %v230_v14  ;;  %v221_v32 = vsel %vm213_vm3, %v795_v31, 0.0  ;;  %v243_v37 = vrot.slane %v242_v35, 4 }
 0x139   :  { %v219_v39 = vrot.slane %v218_v34, 1  ;;  %v222_v41 = vrot.slane %v221_v32, 4  ;;  %612 = vpow2.f32 %v203_v30  ;;  %v235_v44 = vsel %vm213_vm3, %v801_v38, 0.0 }
 0x13a   :  { %v233_v42 = vrot.slane %v232_v36, 1  ;;  %v244_v43 = vadd.f32 %v243_v37, %v242_v35  ;;  %v236_v48 = vrot.slane %v235_v44, 4  ;;  %614 = vpow2.f32 %v201_v33 }
 0x13b   :  { %v220_v46 = vadd.f32 %v219_v39, %v218_v34  ;;  %v223_v47 = vadd.f32 %v222_v41, %v221_v32 }
 0x13c   :  { %v611_v49 = vpop.eup %610  ;;  %v234_v50 = vadd.f32 %v233_v42, %v232_v36  ;;  %v245_v51 = vrot.slane %v244_v43, 2  ;;  %v237_v57 = vadd.f32 %v236_v48, %v235_v44 }
 0x13d   :  { %v270_v52 = vadd.f32 1e-20, %v220_v46  ;;  %v224_v53 = vrot.slane %v223_v47, 2  ;;  %v809_v56 = vmul.f32 %v611_v49, %v54_v45 }
 0x13e   :  { %v272_v54 = vadd.f32 1e-20, %v234_v50  ;;  %v246_v55 = vadd.f32 %v245_v51, %v244_v43  ;;  %v238_v3 = vrot.slane %v237_v57, 2 }
 0x13f   :  { %616 = vrcp.f32 %v270_v52  ;;  %v613_v58 = vpop.eup %612  ;;  %v225_v61 = vadd.f32 %v224_v53, %v223_v47  ;;  %v249_v2 = vsel %vm213_vm3, %v809_v56, 0.0  ;;  %vm283_vm9 = vweird.f32 %v270_v52 }
 0x140   :  { %618 = vrcp.f32 %v272_v54  ;;  %v247_v63 = vrot.slane %v246_v55, 1  ;;  %v615_v0 = vpop.eup %614  ;;  %v250_v6 = vrot.slane %v249_v2, 4  ;;  %v816_v7 = vmul.f32 %v613_v58, %v56_v60 }
 0x141   :  { %v226_v4 = vrot.slane %v225_v61, 1  ;;  %v239_v8 = vadd.f32 %v238_v3, %v237_v57  ;;  %v822_v13 = vmul.f32 %v615_v0, %v55_v1  ;;  %v287_v15 = vand.u32 2147483647, %v270_v52 }
 0x142   :  { %v248_v5 = vadd.f32 %v247_v63, %v246_v55  ;;  %v263_v12 = vsel %vm213_vm3, %v816_v7, 0.0  ;;  %v251_v24 = vadd.f32 %v250_v6, %v249_v2  ;;  %v317_v25 = vand.u32 2147483647, %v272_v54 }
 0x143   :  { %v227_v10 = vadd.f32 %v226_v4, %v225_v61  ;;  %v240_v29 = vrot.slane %v239_v8, 1  ;;  %v289_v33 = vand.u32 2147483648, %v270_v52  ;;  %v264_v34 = vrot.slane %v263_v12, 4 }
 0x144   :  { %v818_v11 = vadd.f32 1e-20, %v248_v5  ;;  %vm313_vm10 = vweird.f32 %v272_v54  ;;  %v319_v36 = vand.u32 2147483648, %v272_v54  ;;  %vm828_vm12 = vcmp.eq.f32.partialorder %v287_v15, 8.507059e+37 }
 0x145   :  { %v617_v9 = vpop.eup %616  ;;  %v824_v27 = vadd.f32 1e-20, %v227_v10  ;;  %v256_v39 = vsel %vm213_vm3, %v822_v13, 0.0  ;;  %v252_v42 = vrot.slane %v251_v24, 2  ;;  %v241_v43 = vadd.f32 %v240_v29, %v239_v8 }
 0x146   :  { %v619_v40 = vpop.eup %618  ;;  %v279_v14 = vmul.f32 %v617_v9, %v270_v52  ;;  %620 = vrcp.f32 %v818_v11  ;;  %vm284_vm11 = vweird.f32 %v617_v9  ;;  %vm834_vm14 = vcmp.eq.f32.partialorder %v317_v25, 8.507059e+37 }
 0x147   :  { %v309_v26 = vmul.f32 %v619_v40, %v272_v54  ;;  %622 = vrcp.f32 %v824_v27  ;;  %vm314_vm13 = vweird.f32 %v619_v40  ;;  %v290_v46 = vor.u32 1.1754944e-38, %v289_v33  ;;  %vm285_vm15 = vmor %vm283_vm9, %vm284_vm11 }
 0x148   :  { %v280_v30 = vsub.f32 1.0, %v279_v14  ;;  %v265_v47 = vadd.f32 %v264_v34, %v263_v12  ;;  %v320_v50 = vor.u32 1.1754944e-38, %v319_v36  ;;  %v253_v51 = vadd.f32 %v252_v42, %v251_v24  ;;  %vm315_vm0 = vmor %vm313_vm10, %vm314_vm13 }
 0x149   :  { %v310_v35 = vsub.f32 1.0, %v309_v26  ;;  %v839_v53 = vadd.f32 1e-20, %v241_v43  ;;  %v257_v60 = vrot.slane %v256_v39, 4  ;;  %v347_v3 = vand.u32 2147483647, %v818_v11 }
 0x14a   :  { %v281_v32 = vmul.f32 %v617_v9, %v280_v30  ;;  %v266_v58 = vrot.slane %v265_v47, 2  ;;  %v254_v1 = vrot.slane %v253_v51, 1  ;;  %v349_v6 = vand.u32 2147483648, %v818_v11 }
 0x14b   :  { %v311_v41 = vmul.f32 %v619_v40, %v310_v35  ;;  %624 = vrcp.f32 %v839_v53  ;;  %v302_v10 = vand.u32 2147483647, %v824_v27  ;;  %v304_v12 = vand.u32 2147483648, %v824_v27 }
 0x14c   :  { %v282_v45 = vadd.f32 %v617_v9, %v281_v32  ;;  %v621_v48 = vpop.eup %620  ;;  %v255_v8 = vadd.f32 %v254_v1, %v253_v51  ;;  %v258_v15 = vadd.f32 %v257_v60, %v256_v39  ;;  %vm343_vm3 = vweird.f32 %v818_v11 }
 0x14d   :  { %v312_v49 = vadd.f32 %v619_v40, %v311_v41  ;;  %v339_v57 = vmul.f32 %v621_v48, %v818_v11  ;;  %v623_v61 = vpop.eup %622  ;;  %vm344_vm1 = vweird.f32 %v621_v48  ;;  %vm298_vm4 = vweird.f32 %v824_v27 }
 0x14e   :  { %v286_v55 = vsel %vm285_vm15, %v617_v9, %v282_v45  ;;  %v294_v54 = vmul.f32 %v623_v61, %v824_v27  ;;  %vm299_vm2 = vweird.f32 %v623_v61  ;;  %vm348_vm5 = vcmp.eq.f32.partialorder %v347_v3, 8.507059e+37  ;;  %vm345_vm7 = vmor %vm343_vm3, %vm344_vm1 }
 0x14f   :  { %v316_v63 = vsel %vm315_vm0, %v619_v40, %v312_v49  ;;  %v291_v0 = vsel %vm828_vm12, %v290_v46, %v286_v55  ;;  %v340_v5 = vsub.f32 1.0, %v339_v57  ;;  %v267_v40 = vadd.f32 %v266_v58, %v265_v47  ;;  %vm300_vm8 = vmor %vm298_vm4, %vm299_vm2 }
 0x150   :  { %v321_v52 = vsel %vm834_vm14, %v320_v50, %v316_v63  ;;  %v292_v2 = vmul.f32 %v291_v0, %v775_v59  ;;  %v295_v9 = vsub.f32 1.0, %v294_v54  ;;  %v855_v59 = vadd.f32 1e-20, %v255_v8 }
 0x151   :  { %v322_v4 = vmul.f32 %v321_v52, %v777_v62  ;;  %v341_v14 = vmul.f32 %v621_v48, %v340_v5  ;;  %v268_v62 = vrot.slane %v267_v40, 1  ;;  %v625_v26 = vpop.eup %624  ;;  %vm303_vm6 = vcmp.eq.f32.partialorder %v302_v10, 8.507059e+37 }
 0x152   :  { %400 = vperm.xlu2 %596, %v292_v2   ;;  %v296_v24 = vmul.f32 %v623_v61, %v295_v9  ;;  %626 = vrcp.f32 %v855_v59  ;;  %v350_v30 = vor.u32 1.1754944e-38, %v349_v6  ;;  %v324_v33 = vmul.f32 %v625_v26, %v839_v53 }
 0x153   :  { %410 = vperm.xlu1 %598, %v322_v4   ;;  %v342_v29 = vadd.f32 %v621_v48, %v341_v14  ;;  %v305_v34 = vor.u32 1.1754944e-38, %v304_v12  ;;  %v269_v36 = vadd.f32 %v268_v62, %v267_v40  ;;  %v259_v32 = vrot.slane %v258_v15, 2 }
 0x154   :  { %v297_v25 = vadd.f32 %v623_v61, %v296_v24  ;;  %v325_v39 = vsub.f32 1.0, %v324_v33  ;;  %v334_v27 = vand.u32 2147483648, %v839_v53  ;;  %vm329_vm9 = vweird.f32 %v625_v26 }
 0x155   :  { %v346_v35 = vsel %vm345_vm7, %v621_v48, %v342_v29  ;;  %v277_v43 = vadd.f32 1e-20, %v269_v36  ;;  %v260_v44 = vadd.f32 %v259_v32, %v258_v15  ;;  %v332_v47 = vand.u32 2147483647, %v839_v53 }
 0x156   :  { %v301_v11 = vsel %vm300_vm8, %v623_v61, %v297_v25  ;;  %v351_v37 = vsel %vm348_vm5, %v350_v30, %v346_v35  ;;  %v326_v46 = vmul.f32 %v625_v26, %v325_v39  ;;  %vm328_vm10 = vweird.f32 %v839_v53 }
 0x157   :  { %v306_v41 = vsel %vm303_vm6, %v305_v34, %v301_v11  ;;  %v352_v42 = vmul.f32 %v351_v37, %v792_v28  ;;  %628 = vrcp.f32 %v277_v43  ;;  %v261_v51 = vrot.slane %v260_v44, 1  ;;  %vm330_vm11 = vmor %vm328_vm10, %vm329_vm9 }
 0x158   :  { %v307_v45 = vmul.f32 %v306_v41, %v795_v31  ;;  %v627_v49 = vpop.eup %626  ;;  %v327_v50 = vadd.f32 %v625_v26, %v326_v46  ;;  %v335_v28 = vor.u32 1.1754944e-38, %v334_v27  ;;  %vm333_vm12 = vcmp.eq.f32.partialorder %v332_v47, 8.507059e+37 }
 0x159   :  { %v354_v48 = vmul.f32 %v627_v49, %v855_v59  ;;  %v262_v31 = vadd.f32 %v261_v51, %v260_v44  ;;  %v364_v58 = vand.u32 2147483648, %v855_v59  ;;  %vm359_vm13 = vweird.f32 %v627_v49 }
 0x15a   :  { %420 = vperm.xlu2 %596, %v352_v42   ;;  %405 = vperm.xlu0 %597, %v307_v45   ;;  %v331_v57 = vsel %vm330_vm11, %v625_v26, %v327_v50  ;;  %v362_v63 = vand.u32 2147483647, %v855_v59  ;;  %vm358_vm14 = vweird.f32 %v855_v59  ;;  %v394_v6 = vand.u32 2147483648, %v277_v43 }
 0x15b   :  { %v355_v55 = vsub.f32 1.0, %v354_v48  ;;  %v336_v60 = vsel %vm333_vm12, %v335_v28, %v331_v57  ;;  %v276_v0 = vadd.f32 1e-20, %v262_v31  ;;  %vm360_vm15 = vmor %vm358_vm14, %vm359_vm13  ;;  %v365_v54 = vor.u32 1.1754944e-38, %v364_v58 }
 0x15c   :  { %v337_v52 = vmul.f32 %v336_v60, %v801_v38  ;;  %vm363_vm0 = vcmp.eq.f32.partialorder %v362_v63, 8.507059e+37  ;;  %v392_v10 = vand.u32 2147483647, %v277_v43  ;;  %vm388_vm2 = vweird.f32 %v277_v43 }
 0x15d   :  { %v356_v61 = vmul.f32 %v627_v49, %v355_v55  ;;  %v629_v1 = vpop.eup %628  ;;  %630 = vrcp.f32 %v276_v0  ;;  %v395_v40 = vor.u32 1.1754944e-38, %v394_v6  ;;  %v379_v62 = vand.u32 2147483648, %v276_v0 }
 0x15e   :  { %v384_v53 = vmul.f32 %v629_v1, %v277_v43  ;;  %vm389_vm1 = vweird.f32 %v629_v1  ;;  %vm393_vm4 = vcmp.eq.f32.partialorder %v392_v10, 8.507059e+37  ;;  %v377_v29 = vand.u32 2147483647, %v276_v0 }
 0x15f   :  { %v357_v2 = vadd.f32 %v627_v49, %v356_v61  ;;  %vm390_vm3 = vmor %vm388_vm2, %vm389_vm1  ;;  %vm373_vm6 = vweird.f32 %v276_v0  ;;  %v380_v30 = vor.u32 1.1754944e-38, %v379_v62  ;;  %v518_v41 = vlaneseq }
 0x160   :  { %v385_v4 = vsub.f32 1.0, %v384_v53  ;;  %vm378_vm8 = vcmp.eq.f32.partialorder %v377_v29, 8.507059e+37  ;;  %vm502_vm9 = vcmask 1041409   ;;  %vm504_vm10 = vcmask 1042434  }
 0x161   :  { %v361_v3 = vsel %vm360_vm15, %v627_v49, %v357_v2  ;;  %v879_v47 = vand.u32 127, %v518_v41  ;;  %vm506_vm11 = vcmask 1043459   ;;  %vm508_vm12 = vcmask 1044484  }
 0x162   :  { %415 = vperm.xlu2 %596, %v337_v52   ;;  %v366_v5 = vsel %vm363_vm0, %v365_v54, %v361_v3  ;;  %v386_v9 = vmul.f32 %v629_v1, %v385_v4  ;;  %vm510_vm13 = vcmask 1045509   ;;  %vm512_vm14 = vcmask 1046534  }
 0x163   :  { %v367_v8 = vmul.f32 %v366_v5, %v809_v56  ;;  %v631_v12 = vpop.eup %630  ;;  %vm514_vm15 = vcmask 1047559   ;;  %vm536_vm0 = vcmask 64512  }
 0x164   :  { %v387_v38 = vadd.f32 %v629_v1, %v386_v9  ;;  %v369_v14 = vmul.f32 %v631_v12, %v276_v0  ;;  %vm374_vm5 = vweird.f32 %v631_v12 }
 0x165   :  { %425 = vperm.xlu1 %598, %v367_v8   ;;  %vm375_vm7 = vmor %vm373_vm6, %vm374_vm5 }
 0x166   :  { %v391_v59 = vsel %vm390_vm3, %v629_v1, %v387_v38  ;;  %v370_v24 = vsub.f32 1.0, %v369_v14 }
 0x167   :  { %v396_v15 = vsel %vm393_vm4, %v395_v40, %v391_v59 }
 0x168   :  { %v371_v26 = vmul.f32 %v631_v12, %v370_v24  ;;  %v397_v56 = vmul.f32 %v396_v15, %v816_v7 }
 0x16a   :  { %v372_v25 = vadd.f32 %v631_v12, %v371_v26 }
 0x16c   :  { %v376_v33 = vsel %vm375_vm7, %v631_v12, %v372_v25 }
 0x16d   :  { %435 = vperm.xlu1 %598, %v397_v56   ;;  %v381_v34 = vsel %vm378_vm8, %v380_v30, %v376_v33 }
 0x16e   :  { %v382_v35 = vmul.f32 %v381_v34, %v822_v13 }
 0x170   :  { %430 = vperm.xlu2 %596, %v382_v35  }
 0x1ac   :  { %v401_v36 = vpop.permute.xlu2 %400 }
 0x1ad   :  { %v438_v11 = vmul.f32 %v401_v36, %v710_v16 }
 0x1af   :  { %v446_v27 = vrot.slane %v438_v11, 4 }
 0x1b1   :  { %v447_v45 = vadd.f32 %v446_v27, %v438_v11 }
 0x1b3   :  { %v448_v28 = vrot.slane %v447_v45, 2 }
 0x1b4   :  { %v421_v32 = vpop.permute.xlu2 %420 }
 0x1b5   :  { %v442_v46 = vmul.f32 %v421_v32, %v720_v18  ;;  %v449_v60 = vadd.f32 %v448_v28, %v447_v45  ;;  %v524_v38 = vperm.slane %v421_v32, %v879_v47 }
 0x1b7   :  { %v450_v4 = vrot.slane %v449_v60, 1 }
 0x1b9   :  { %v451_v15 = vadd.f32 %v450_v4, %v449_v60 }
 0x1bc   :  { %v416_v37 = vpop.permute.xlu2 %415 }
 0x1bd   :  { %v441_v42 = vmul.f32 %v416_v37, %v739_v21  ;;  %v520_v21 = vperm.slane %v401_v36, %v879_v47  ;;  %v523_v54 = vperm.slane %v416_v37, %v879_v47 }
 0x1bf   :  { %v464_v49 = vrot.slane %v441_v42, 4 }
 0x1c1   :  { %v465_v57 = vadd.f32 %v464_v49, %v441_v42 }
 0x1c3   :  { %v466_v1 = vrot.slane %v465_v57, 2 }
 0x1c5   :  { %v411_v39 = vpop.permute.xlu1 %410  ;;  %v467_v8 = vadd.f32 %v466_v1, %v465_v57 }
 0x1c6   :  { %v440_v7 = vmul.f32 %v411_v39, %v715_v17  ;;  %v470_v17 = vrot.slane %v442_v46, 4  ;;  %v522_v0 = vperm.slane %v411_v39, %v879_v47 }
 0x1c7   :  { %v468_v26 = vrot.slane %v467_v8, 1 }
 0x1c8   :  { %v458_v13 = vrot.slane %v440_v7, 4  ;;  %v471_v61 = vadd.f32 %v470_v17, %v442_v46 }
 0x1ca   :  { %v431_v16 = vpop.permute.xlu2 %430  ;;  %v459_v55 = vadd.f32 %v458_v13, %v440_v7  ;;  %v472_v5 = vrot.slane %v471_v61, 2 }
 0x1cb   :  { %v444_v31 = vmul.f32 %v431_v16, %v726_v19  ;;  %v526_v30 = vperm.slane %v431_v16, %v879_v47 }
 0x1cc   :  { %v406_v43 = vpop.permute.xlu0 %405  ;;  %v460_v63 = vrot.slane %v459_v55, 2  ;;  %v473_v24 = vadd.f32 %v472_v5, %v471_v61 }
 0x1cd   :  { %v439_v44 = vmul.f32 %v406_v43, %v734_v20  ;;  %v521_v51 = vperm.slane %v406_v43, %v879_v47  ;;  %v482_v52 = vrot.slane %v444_v31, 4 }
 0x1ce   :  { %v461_v6 = vadd.f32 %v460_v63, %v459_v55  ;;  %v474_v41 = vrot.slane %v473_v24, 1 }
 0x1cf   :  { %v452_v48 = vrot.slane %v439_v44, 4  ;;  %v528_v58 = vsel %vm502_vm9, %v521_v51, %v520_v21  ;;  %v483_v40 = vadd.f32 %v482_v52, %v444_v31 }
 0x1d0   :  { %v529_v2 = vsel %vm504_vm10, %v522_v0, %v528_v58  ;;  %v462_v62 = vrot.slane %v461_v6, 1 }
 0x1d1   :  { %v453_v50 = vadd.f32 %v452_v48, %v439_v44  ;;  %v530_v9 = vsel %vm506_vm11, %v523_v54, %v529_v2  ;;  %v484_v25 = vrot.slane %v483_v40, 2  ;;  %v469_v44 = vadd.f32 %v468_v26, %v467_v8 }
 0x1d2   :  { %v463_v11 = vadd.f32 %v462_v62, %v461_v6 }
 0x1d3   :  { %v454_v20 = vrot.slane %v453_v50, 2  ;;  %v485_v42 = vadd.f32 %v484_v25, %v483_v40 }
 0x1d5   :  { %v455_v18 = vadd.f32 %v454_v20, %v453_v50  ;;  %v486_v49 = vrot.slane %v485_v42, 1 }
 0x1d7   :  { %v426_v53 = vpop.permute.xlu1 %425  ;;  %v456_v3 = vrot.slane %v455_v18, 1  ;;  %v487_v28 = vadd.f32 %v486_v49, %v485_v42 }
 0x1d8   :  { %v443_v19 = vmul.f32 %v426_v53, %v744_v22  ;;  %v525_v12 = vperm.slane %v426_v53, %v879_v47  ;;  %v531_v22 = vsel %vm508_vm12, %v524_v38, %v530_v9 }
 0x1d9   :  { %v457_v14 = vadd.f32 %v456_v3, %v455_v18 }
 0x1da   :  { %v476_v10 = vrot.slane %v443_v19, 4  ;;  %v532_v56 = vsel %vm510_vm13, %v525_v12, %v531_v22 }
 0x1db   :  { %v503_v34 = vsel %vm502_vm9, %v457_v14, %v451_v15  ;;  %v533_v37 = vsel %vm512_vm14, %v526_v30, %v532_v56 }
 0x1dc   :  { %v477_v59 = vadd.f32 %v476_v10, %v443_v19  ;;  %v505_v43 = vsel %vm504_vm10, %v463_v11, %v503_v34 }
 0x1de   :  { %v478_v29 = vrot.slane %v477_v59, 2 }
 0x1df   :  { %v436_v33 = vpop.permute.xlu1 %435 }
 0x1e0   :  { %v479_v35 = vadd.f32 %v478_v29, %v477_v59  ;;  %v445_v36 = vmul.f32 %v436_v33, %v750_v23  ;;  %v527_v32 = vperm.slane %v436_v33, %v879_v47  ;;  %v507_v23 = vsel %vm506_vm11, %v469_v44, %v505_v43 }
 0x1e1   :  { %v475_v47 = vadd.f32 %v474_v41, %v473_v24 }
 0x1e2   :  { %v480_v39 = vrot.slane %v479_v35, 1  ;;  %v488_v27 = vrot.slane %v445_v36, 4  ;;  %v534_v7 = vsel %vm514_vm15, %v527_v32, %v533_v37 }
 0x1e3   :  { %537 = vst.msk [vmem:[%s915_s4] sm:$0xff] %vm536_vm0, %v534_v7  ;;  %v509_v16 = vsel %vm508_vm12, %v475_v47, %v507_v23 }
 0x1e4   :  { %v489_v45 = vadd.f32 %v488_v27, %v445_v36  ;;  %v481_v46 = vadd.f32 %v480_v39, %v479_v35 }
 0x1e6   :  { %v490_v13 = vrot.slane %v489_v45, 2  ;;  %v511_v50 = vsel %vm510_vm13, %v481_v46, %v509_v16 }
 0x1e7   :  { %v513_v55 = vsel %vm512_vm14, %v487_v28, %v511_v50 }
 0x1e8   :  { %v491_v48 = vadd.f32 %v490_v13, %v489_v45 }
 0x1ea   :  { %v492_v51 = vrot.slane %v491_v48, 1 }
 0x1ec   :  { %v493_v17 = vadd.f32 %v492_v51, %v491_v48 }
 0x1ee   :  { %v515_v21 = vsel %vm514_vm15, %v493_v17, %v513_v55 }
 0x1ef   :  { %517 = vst [vmem:[%s916_s3] sm:$0xff] %v515_v21 }

</bundles_post_ra>
